<compile_context>
chip_gen: v7x
topology: tpu7x:2x2x1
jax: 0.10.0
libtpu: 0.0.40
codegen_flags: <defaults>
</compile_context>

<pallas_src>
import functools

import jax
import jax.numpy as jnp
from jax.experimental import pallas as pl
from jax.experimental.pallas import tpu as pltpu


def _cos_softmax_kernel(logits_ref, targets_ref, out_ref, *, scale, margin, tile_c):
    # Grid axis 0 is the class-tile axis.
    j = pl.program_id(0)

    logits = logits_ref[...].astype(jnp.float32)          # (TB, TC)
    tgt_local = targets_ref[...] - j * tile_c              # (TB, 1) int32

    # Plain iota over the lane tile; the tile origin was folded into tgt_local.
    class_ids = jax.lax.broadcasted_iota(jnp.int32, logits.shape, dimension=1)

    shift = jnp.where(class_ids == tgt_local, jnp.float32(margin), jnp.float32(0.0))
    out_ref[...] = (jnp.float32(scale) * (logits - shift)).astype(out_ref.dtype)


def _round_up(n, mult):
    return ((n + mult - 1) // mult) * mult


def cos_softmax(
    logits,
    targets,
    *,
    num_classes,
    scale,
    margin,
    tb=512,
    tc=2048,
    vmem_limit_bytes=48 << 20,
):
    """logits: [B, num_classes] (f32 or bf16), targets: [B] int -> [B, num_classes]."""
    B, C = logits.shape
    assert C == num_classes

    itemsize = jnp.dtype(logits.dtype).itemsize
    # Sublane packing: 8 rows per vreg for 32-bit, 16 for 16-bit dtypes.
    sub_mult = 8 if itemsize >= 4 else (16 if itemsize == 2 else 32)

    TB = min(tb, _round_up(B, sub_mult))
    TC = min(tc, _round_up(C, 128))
    full_c = _round_up(C, 128)

    # Auto-grow the lane tile when the batch tile is small so each grid step
    # moves ~4 MiB (keeps the kernel on the HBM roofline instead of paying
    # per-step overhead).
    target_tile_bytes = 4 << 20
    max_tile_bytes = 8 << 20
    if TB * TC * itemsize < target_tile_bytes and TC < full_c:
        needed = _round_up(-(-target_tile_bytes // (TB * itemsize)), 128)
        TC = min(full_c, max(TC, needed))
    # Cap the tile so double-buffered in+out stays well inside scoped VMEM.
    while TB * TC * itemsize > max_tile_bytes and TC > 128:
        TC = max(128, _round_up(TC // 2, 128))
    while TB * TC * itemsize > max_tile_bytes and TB > sub_mult:
        TB = max(sub_mult, _round_up(TB // 2, sub_mult))

    grid_b = pl.cdiv(B, TB)
    grid_c = pl.cdiv(C, TC)

    targets2d = targets.reshape(B, 1).astype(jnp.int32)

    kernel = functools.partial(
        _cos_softmax_kernel, scale=float(scale), margin=float(margin), tile_c=TC
    )

    return pl.pallas_call(
        kernel,
        out_shape=jax.ShapeDtypeStruct((B, C), logits.dtype),
        # Class axis first: it is the large axis for re-ID heads, so it splits
        # across both TensorCores on v7x even when grid_b == 1.
        grid=(grid_c, grid_b),
        in_specs=[
            pl.BlockSpec((TB, TC), lambda j, i: (i, j)),
            pl.BlockSpec((TB, 1), lambda j, i: (i, 0)),
        ],
        out_specs=pl.BlockSpec((TB, TC), lambda j, i: (i, j)),
        compiler_params=pltpu.CompilerParams(
            dimension_semantics=("parallel", "parallel"),
            vmem_limit_bytes=vmem_limit_bytes,
        ),
    )(logits, targets2d)


def cos_softmax_ref(logits, targets, *, num_classes, scale, margin):
    """Pure-JAX reference mirroring the PyTorch CosSoftmax forward."""
    phi = logits - margin
    onehot = jax.nn.one_hot(targets, num_classes, dtype=logits.dtype)
    out = onehot * phi + (1.0 - onehot) * logits
    return out * scale


if __name__ == "__main__":
    # Module hyper-parameters (fastreid-style defaults).
    num_classes = 32
    scale = 30.0
    margin = 0.35

    batch = 8
    key = jax.random.PRNGKey(0)
    k_logits, k_targets = jax.random.split(key)

    # Cosine-similarity-like logits in [-1, 1], as CosSoftmax expects.
    logits = jax.random.uniform(
        k_logits, (batch, num_classes), dtype=jnp.float32, minval=-1.0, maxval=1.0
    )
    targets = jax.random.randint(k_targets, (batch,), 0, num_classes, dtype=jnp.int32)

    out = cos_softmax(
        logits, targets, num_classes=num_classes, scale=scale, margin=margin
    )
    out = jax.block_until_ready(out)

    ref = cos_softmax_ref(
        logits, targets, num_classes=num_classes, scale=scale, margin=margin
    )
    assert out.shape == (batch, num_classes)
    assert jnp.allclose(out, ref, atol=1e-5, rtol=1e-5), "mismatch vs reference"

    print("KERNEL_OK")
</pallas_src>

<mosaic_0001>
module attributes {stable_mosaic.version = 11 : i64} {
  func.func @_cos_softmax_kernel(%arg0: i32, %arg1: i32, %arg2: memref<8x128xf32, #tpu.memory_space<vmem>>, %arg3: memref<8x1xi32, #tpu.memory_space<vmem>>, %arg4: memref<8x128xf32, #tpu.memory_space<vmem>>) attributes {dimension_semantics = [#tpu.dimension_semantics<parallel>, #tpu.dimension_semantics<parallel>], iteration_bounds = array<i64: 1, 1>, scalar_prefetch = 0 : i64, scratch_operands = 0 : i64, tpu.core_type = #tpu.core_type<tc>, window_params = [{transform_indices = @transform_0, window_bounds = array<i64: 8, 128>}, {transform_indices = @transform_1, window_bounds = array<i64: 8, 1>}, {transform_indices = @transform_2, window_bounds = array<i64: 8, 128>}]} {
    %c0 = arith.constant 0 : index
    %c0_0 = arith.constant 0 : index
    %0 = vector.load %arg2[%c0, %c0_0] : memref<8x128xf32, #tpu.memory_space<vmem>>, vector<8x128xf32>
    %c0_1 = arith.constant 0 : index
    %c0_2 = arith.constant 0 : index
    %1 = vector.load %arg3[%c0_1, %c0_2] : memref<8x1xi32, #tpu.memory_space<vmem>>, vector<8x1xi32>
    %c128_i32 = arith.constant 128 : i32
    %2 = arith.muli %arg0, %c128_i32 : i32
    %3 = vector.broadcast %2 : i32 to vector<8x1xi32>
    %4 = arith.subi %1, %3 : vector<8x1xi32>
    %5 = tpu.iota {dimensions = array<i32: 1>} : vector<8x128xi32>
    %6 = vector.broadcast %4 : vector<8x1xi32> to vector<8x128xi32>
    %7 = arith.cmpi eq, %5, %6 : vector<8x128xi32>
    %cst = arith.constant 3.500000e-01 : f32
    %cst_3 = arith.constant 0.000000e+00 : f32
    %8 = vector.broadcast %cst : f32 to vector<8x128xf32>
    %9 = vector.broadcast %cst_3 : f32 to vector<8x128xf32>
    %10 = arith.select %7, %8, %9 : vector<8x128xi1>, vector<8x128xf32>
    %11 = arith.subf %0, %10 : vector<8x128xf32>
    %cst_4 = arith.constant 3.000000e+01 : f32
    %12 = vector.broadcast %cst_4 : f32 to vector<8x128xf32>
    %13 = arith.mulf %12, %11 : vector<8x128xf32>
    %c0_5 = arith.constant 0 : index
    %c0_6 = arith.constant 0 : index
    %14 = vector.load %arg4[%c0_5, %c0_6] : memref<8x128xf32, #tpu.memory_space<vmem>>, vector<8x128xf32>
    tpu.vector_store %arg4[%c0_5, %c0_6], %13 {strides = array<i32>} : memref<8x128xf32, #tpu.memory_space<vmem>>, vector<8x128xf32>,
    return
  }
  func.func @transform_0(%arg0: i32, %arg1: i32) -> (i32, i32) {
    %c0_i32 = arith.constant 0 : i32
    return %arg1, %arg0 : i32, i32
  }
  func.func @transform_1(%arg0: i32, %arg1: i32) -> (i32, i32) {
    %c0_i32 = arith.constant 0 : i32
    %c0_i32_0 = arith.constant 0 : i32
    return %arg1, %c0_i32 : i32, i32
  }
  func.func @transform_2(%arg0: i32, %arg1: i32) -> (i32, i32) {
    %c0_i32 = arith.constant 0 : i32
    return %arg1, %arg0 : i32, i32
  }
}

</mosaic_0001>

<bundles_post_ra>
// kernel: tpu_custom_call.1
= control target key start
LH: loop header
LB: loop body
LE: loop exit
PB: predicated region body
PF: predicated region fallthrough
CT: control target
= control target key end

     0   :  { %s105_s0 = inlined_call_operand.vmem [shape: f32[8,32], index: 0, kind: input, shape index: {}]   ;;  %s106_s1 = inlined_call_operand.vmem [shape: s32[8,1], index: 1, kind: input, shape index: {}]   ;;  %s107_s2 = inlined_call_operand.hbm [shape: f32[8,32], index: 2, kind: output, shape index: {}]  }
   0x1   :  { %v13_v0 = vld [vmem:[%s106_s1] sm:$0xff] }
   0x2   :  { %7 = vsyncpa [#allocation3], 0  ;;  %v69_v1 = vmov 0   ;;  %v17_v2 = vlaneseq  ;;  %v12_v5 = vld [vmem:[%s105_s0] sm:$0xff]  ;;  %v70_v6 = vmov 0.0   ;;  %s71_s13 = smov [#allocation2]  }
   0x3   :  { %44 = vset.pattern.permute.xlu0 %v69_v1  ;;  %s33_s14 = sshll.u32 %s71_s13, 4  ;;  %s34_s14 = int_to_ptr.vmem [resolvable:$true] %s33_s14 }
   0x4   :  { %20 = vperm.xlu0 %44, %v13_v0   ;;  %v18_v3 = vand.u32 127, %v17_v2  ;;  %s45_s1 = scalar_lea.vmem %s34_s14, 128  ;;  %p50_p1 = scmp.lt.s32.totalorder %s34_s14, %s34_s14 }
   0x5   :  { %p46_p0 = scmp.ne.s32.totalorder %s34_s14, %s45_s1  ;;  %p51_p2 = scmp.lt.s32.totalorder %s45_s1, %s45_s1 }
   0x7   :  { %p52_p3 = por %p51_p2, %p50_p1 }
   0x9   :  { %p53_p4 = pnand %p52_p3, %p46_p0 }
  0x83   :  { %v21_v4 = vpop.permute.xlu0 %20 }
  0x84   :  { %vm22_vm0 = vcmp.eq.s32.totalorder %v18_v3, %v21_v4 }
  0x85   :  { %v23_v7 = vsel %vm22_vm0, 0.35, %v70_v6 }
  0x86   :  { %v24_v8 = vsub.f32 %v12_v5, %v23_v7 }
  0x88   :  { %v25_v9 = vmul.f32 30.0, %v24_v8 }
  0x8a   :  { %26 = vst [vmem:[#allocation2] sm:$0xff] %v25_v9 }
  0x8b   :  { %56 = shalt.err (!%p53_p4)
}
  0x8c   :  { %s57_s0 = scalar_lea.hbm %s107_s2, 128 }
  0x8d   :  { %p58_p5 = scmp.ne.s32.totalorder %s107_s2, %s57_s0  ;;  %p61_p6 = scmp.lt.u32.totalorder %s57_s0, %s107_s2 }
  0x8f   :  { %p63_p7 = pnand %p61_p6, %p58_p5 }
  0x91   :  { %66 = shalt.err (!%p63_p7)
}
  0x92   :  { %36 = dma.vmem_to_hbm [thread:$0]  %s34_s14, 128, %s107_s2, [#allocation3]  }
  0x93   :  { %67 = dma.done.wait [#allocation3], 128  }
  0x94   :  { %68 = vsyncadd [#allocation3], 4294967168 }
  0x95   :  { %40 = vsyncpa [#allocation3], 1 }

</bundles_post_ra>
